<compile_context>
chip_gen: v7x
topology: tpu7x:2x2x1
jax: 0.10.0
libtpu: 0.0.40
codegen_flags: <defaults>
</compile_context>

<pallas_src>
import functools

import jax
import jax.numpy as jnp
from jax.experimental import pallas as pl
from jax.experimental.pallas import tpu as pltpu

ALPHA = 0.25
GAMMA = 2.0  # compile-time constant; implemented as an explicit square below
# TODO(synk): general (non-integer) gamma would need a pow -> exp/log per element.

_LANES = 128
_MAX_BLOCK_ROWS = 8192                 # 8192x128 f32 = 4 MiB per input per buffer
_VMEM_LIMIT_BYTES = 32 * 1024 * 1024   # safe on v5e/v6e (128 MiB phys) and v7x (64 MiB)


def _cdiv(a, b):
    return -(-a // b)


def _num_tensorcores():
    """Best-effort TensorCores-per-chip (2 on v7x, 1 on v5e/v6e). Falls back to 1."""
    try:
        info = pltpu.get_tpu_info()
        for attr in ("num_cores", "core_count", "num_tensor_cores",
                     "tensorcores_per_chip"):
            v = getattr(info, attr, None)
            if v is None:
                continue
            try:
                v = int(v)
            except Exception:
                continue
            if v >= 1:
                return min(v, 2)
    except Exception:
        pass
    try:
        v = getattr(jax.devices()[0], "num_cores", None)
        if v is not None:
            v = int(v)
            if v >= 1:
                return min(v, 2)
    except Exception:
        pass
    return 1


def _focal_sum_kernel(logits_ref, targets_ref, out_ref, acc_ref, *,
                      m, block_rows, blocks_per_split, needs_mask):
    c = pl.program_id(0)   # TensorCore-split axis ("parallel")
    i = pl.program_id(1)   # reduction axis ("arbitrary")

    @pl.when(i == 0)
    def _():
        acc_ref[...] = jnp.zeros_like(acc_ref)

    x = logits_ref[...].astype(jnp.float32)
    t = targets_ref[...].astype(jnp.float32)

    # One exp per element feeds both the stable BCE term and the sigmoid:
    #   e      = exp(-|x|)
    #   bce    = max(x, 0) - x*t + log1p(e)
    #   1 - pt = sigmoid(-x) if t == 1 else sigmoid(x)
    #          = e*inv if (x >= 0) == (t == 1) else inv,  with inv = 1/(1+e)
    e = jnp.exp(-jnp.abs(x))
    bce = jnp.maximum(x, 0.0) - x * t + jnp.log1p(e)
    inv = pl.reciprocal(1.0 + e, approx=True)          # EUP slot, ~free
    one_minus_pt = jnp.where((x >= 0.0) == (t == 1.0), e * inv, inv)
    focal = bce * (one_minus_pt * one_minus_pt)         # gamma == 2 -> square
    # (alpha is folded into the final scalar in the wrapper.)

    if block_rows % 8 == 0:
        def _accumulate(vals):
            # VPU-only partial reduce into the (8, 128) vector accumulator.
            # The reshape is vreg-tile aligned so it should stay in registers.
            acc_ref[...] += jnp.sum(vals.reshape(block_rows // 8, 8, _LANES), axis=0)
    else:
        # Only reachable for tiny single-block inputs (block_rows == m, m % 8 != 0).
        def _accumulate(vals):
            acc_ref[0:1, :] += jnp.sum(vals, axis=0, keepdims=True)

    if needs_mask:
        # Only the globally-last (possibly partial) block and phantom blocks
        # introduced by the core split pay for the mask; all other steps take
        # the unmasked fast path (no iota / compare / select per element).
        b = c * blocks_per_split + i            # global block index (unclamped)
        row_start = b * block_rows
        is_full = row_start + block_rows <= m

        @pl.when(is_full)
        def _():
            _accumulate(focal)

        @pl.when(jnp.logical_not(is_full))
        def _():
            # Rows >= m hold garbage (partial edge block, or a phantom block
            # whose index was clamped in the index_map). jnp.where is a true
            # select, so NaN/Inf garbage never reaches the sum.
            valid_rows = m - row_start          # <= 0 for phantom blocks
            row = jax.lax.broadcasted_iota(jnp.int32, (block_rows, _LANES), 0)
            _accumulate(jnp.where(row < valid_rows, focal, 0.0))
    else:
        _accumulate(focal)

    @pl.when(i == blocks_per_split - 1)
    def _():
        # Single cross-lane reduce per core, once per reduction run.
        out_ref[0, 0] = jnp.sum(acc_ref[...])


def _focal_sum_jnp(x, t):
    """Plain-jnp focal sum (no alpha) for the <128-element tail / tiny inputs."""
    x = x.astype(jnp.float32)
    t = t.astype(jnp.float32)
    e = jnp.exp(-jnp.abs(x))
    bce = jnp.maximum(x, 0.0) - x * t + jnp.log1p(e)
    inv = 1.0 / (1.0 + e)
    one_minus_pt = jnp.where((x >= 0.0) == (t == 1.0), e * inv, inv)
    return jnp.sum(bce * one_minus_pt * one_minus_pt)


def focal_loss(logits, targets):
    """Mean binary focal loss over all elements (alpha=0.25, gamma=2)."""
    total_n = logits.size
    if total_n == 0:
        return jnp.float32(float("nan"))

    # Narrow targets only where lossless (bool -> int8). Float / soft targets
    # pass through unchanged (the kernel casts to f32 in-register), preserving
    # the reference semantics for non-binary targets.
    if targets.dtype == jnp.bool_:
        targets = targets.astype(jnp.int8)

    lg = logits.reshape(-1)
    tg = targets.reshape(-1)

    tail_n = total_n % _LANES
    n_main = total_n - tail_n

    tail_sum = jnp.float32(0.0)
    if tail_n:
        # TODO(synk): the prefix slice below may materialize a copy; only taken
        # when the element count is not a multiple of 128.
        tail_sum = _focal_sum_jnp(lg[n_main:], tg[n_main:])
        lg = lg[:n_main]
        tg = tg[:n_main]

    if n_main == 0:
        return (ALPHA * tail_sum) / jnp.float32(total_n)

    m = n_main // _LANES                  # rows of 128 lanes (no jnp.pad pass)
    lg2 = lg.reshape(m, _LANES)
    tg2 = tg.reshape(m, _LANES)

    block_rows = min(_MAX_BLOCK_ROWS, m)
    blocks_total = _cdiv(m, block_rows)

    num_splits = _num_tensorcores()
    if blocks_total < 2:
        num_splits = 1
    blocks_per_split = _cdiv(blocks_total, num_splits)
    needs_mask = (m % block_rows != 0) or (num_splits * blocks_per_split != blocks_total)

    kernel = functools.partial(
        _focal_sum_kernel,
        m=m, block_rows=block_rows, blocks_per_split=blocks_per_split,
        needs_mask=needs_mask)

    # Phantom blocks (core split not dividing blocks_total) are clamped to the
    # last real block here and fully masked out inside the kernel.
    def in_map(c, i):
        b = c * blocks_per_split + i
        return (jnp.minimum(b, blocks_total - 1), 0)

    partials = pl.pallas_call(
        kernel,
        out_shape=jax.ShapeDtypeStruct((num_splits, 1), jnp.float32),
        grid_spec=pltpu.PrefetchScalarGridSpec(
            num_scalar_prefetch=0,
            grid=(num_splits, blocks_per_split),
            in_specs=[
                pl.BlockSpec((block_rows, _LANES), in_map),
                pl.BlockSpec((block_rows, _LANES), in_map),
            ],
            out_specs=pl.BlockSpec((1, 1), lambda c, i: (c, 0),
                                   memory_space=pltpu.SMEM),
            scratch_shapes=[pltpu.VMEM((8, _LANES), jnp.float32)],
        ),
        compiler_params=pltpu.CompilerParams(
            dimension_semantics=("parallel", "arbitrary"),
            vmem_limit_bytes=_VMEM_LIMIT_BYTES),
    )(lg2, tg2)

    total = jnp.sum(partials) + tail_sum
    return (ALPHA * total) / jnp.float32(total_n)


def _focal_loss_ref(logits, targets):
    x = logits.astype(jnp.float32)
    t = targets.astype(jnp.float32)
    bce = jnp.maximum(x, 0.0) - x * t + jnp.log1p(jnp.exp(-jnp.abs(x)))
    p = jax.nn.sigmoid(x)
    pt = jnp.where(t == 1.0, p, 1.0 - p)
    return jnp.mean(ALPHA * (1.0 - pt) ** GAMMA * bce)


if __name__ == "__main__":
    key = jax.random.PRNGKey(0)
    k1, k2 = jax.random.split(key)
    # NCHW-style logits (B=2, C=4, H=16, W=16) and binary targets (int8).
    logits = jax.random.normal(k1, (2, 4, 16, 16), dtype=jnp.float32) * 2.0
    targets = jax.random.bernoulli(k2, 0.3, (2, 4, 16, 16)).astype(jnp.int8)

    loss = focal_loss(logits, targets)
    jax.block_until_ready(loss)

    ref = _focal_loss_ref(logits, targets)
    # Tolerance loosened slightly because the kernel uses pl.reciprocal(approx=True).
    assert jnp.allclose(loss, ref, rtol=2e-3, atol=1e-6), (loss, ref)
    print("KERNEL_OK")
</pallas_src>

<mosaic_0001>
module attributes {stable_mosaic.version = 11 : i64} {
  func.func @_focal_sum_kernel(%arg0: i32, %arg1: i32, %arg2: memref<16x128xf32, #tpu.memory_space<vmem>>, %arg3: memref<16x128xi8, #tpu.memory_space<vmem>>, %arg4: memref<1x1xf32, #tpu.memory_space<smem>>, %arg5: memref<8x128xf32, #tpu.memory_space<vmem>>) attributes {dimension_semantics = [#tpu.dimension_semantics<parallel>, #tpu.dimension_semantics<arbitrary>], iteration_bounds = array<i64: 1, 1>, scalar_prefetch = 0 : i64, scratch_operands = 1 : i64, tpu.core_type = #tpu.core_type<tc>, window_params = [{transform_indices = @transform_0, window_bounds = array<i64: 16, 128>}, {transform_indices = @transform_1, window_bounds = array<i64: 16, 128>}, {transform_indices = @transform_2, window_bounds = array<i64: 1, 1>}]} {
    %c0_i32 = arith.constant 0 : i32
    %0 = arith.cmpi eq, %arg1, %c0_i32 : i32
    %1 = arith.extui %0 : i1 to i32
    %c0_i32_0 = arith.constant 0 : i32
    %2 = arith.cmpi ne, %1, %c0_i32_0 : i32
    scf.if %2 {
      %cst_16 = arith.constant 0.000000e+00 : f32
      %37 = vector.broadcast %cst_16 : f32 to vector<8x128xf32>
      %c0_17 = arith.constant 0 : index
      %c0_18 = arith.constant 0 : index
      %38 = vector.load %arg5[%c0_17, %c0_18] : memref<8x128xf32, #tpu.memory_space<vmem>>, vector<8x128xf32>
      tpu.vector_store %arg5[%c0_17, %c0_18], %37 {strides = array<i32>} : memref<8x128xf32, #tpu.memory_space<vmem>>, vector<8x128xf32>,
    } else {
    }
    %c0 = arith.constant 0 : index
    %c0_1 = arith.constant 0 : index
    %3 = vector.load %arg2[%c0, %c0_1] : memref<16x128xf32, #tpu.memory_space<vmem>>, vector<16x128xf32>
    %c0_2 = arith.constant 0 : index
    %c0_3 = arith.constant 0 : index
    %4 = vector.load %arg3[%c0_2, %c0_3] : memref<16x128xi8, #tpu.memory_space<vmem>>, vector<16x128xi8>
    %5 = arith.sitofp %4 : vector<16x128xi8> to vector<16x128xf32>
    %6 = math.absf %3 : vector<16x128xf32>
    %cst = arith.constant 0.000000e+00 : f32
    %7 = vector.broadcast %cst : f32 to vector<16x128xf32>
    %8 = arith.subf %7, %6 : vector<16x128xf32>
    %9 = math.exp %8 : vector<16x128xf32>
    %cst_4 = arith.constant 0.000000e+00 : f32
    %10 = vector.broadcast %cst_4 : f32 to vector<16x128xf32>
    %11 = arith.maximumf %3, %10 : vector<16x128xf32>
    %12 = arith.mulf %3, %5 : vector<16x128xf32>
    %13 = arith.subf %11, %12 : vector<16x128xf32>
    %14 = math.log1p %9 : vector<16x128xf32>
    %15 = arith.addf %13, %14 : vector<16x128xf32>
    %cst_5 = arith.constant 1.000000e+00 : f32
    %16 = vector.broadcast %cst_5 : f32 to vector<16x128xf32>
    %17 = arith.addf %16, %9 : vector<16x128xf32>
    %18 = tpu.reciprocal %17 {approx = true} : vector<16x128xf32> -> vector<16x128xf32>
    %cst_6 = arith.constant 0.000000e+00 : f32
    %19 = vector.broadcast %cst_6 : f32 to vector<16x128xf32>
    %20 = arith.cmpf oge, %3, %19 : vector<16x128xf32>
    %cst_7 = arith.constant 1.000000e+00 : f32
    %21 = vector.broadcast %cst_7 : f32 to vector<16x128xf32>
    %22 = arith.cmpf oeq, %5, %21 : vector<16x128xf32>
    %23 = arith.xori %20, %22 : vector<16x128xi1>
    %cst_8 = arith.constant dense<true> : vector<16x128xi1>
    %24 = arith.xori %23, %cst_8 : vector<16x128xi1>
    %25 = arith.mulf %9, %18 : vector<16x128xf32>
    %26 = arith.select %24, %25, %18 : vector<16x128xi1>, vector<16x128xf32>
    %27 = arith.mulf %26, %26 : vector<16x128xf32>
    %28 = arith.mulf %15, %27 : vector<16x128xf32>
    %c0_9 = arith.constant 0 : index
    %c0_10 = arith.constant 0 : index
    %29 = vector.load %arg5[%c0_9, %c0_10] : memref<8x128xf32, #tpu.memory_space<vmem>>, vector<8x128xf32>
    %30 = vector.shape_cast %28 : vector<16x128xf32> to vector<2x8x128xf32>
    %cst_11 = arith.constant dense<0.000000e+00> : vector<8x128xf32>
    %31 = vector.multi_reduction <add>, %30, %cst_11 [0] : vector<2x8x128xf32> to vector<8x128xf32>
    %32 = arith.addf %29, %31 : vector<8x128xf32>
    %c0_12 = arith.constant 0 : index
    %c0_13 = arith.constant 0 : index
    %33 = vector.load %arg5[%c0_12, %c0_13] : memref<8x128xf32, #tpu.memory_space<vmem>>, vector<8x128xf32>
    tpu.vector_store %arg5[%c0_12, %c0_13], %32 {strides = array<i32>} : memref<8x128xf32, #tpu.memory_space<vmem>>, vector<8x128xf32>,
    %c0_i32_14 = arith.constant 0 : i32
    %34 = arith.cmpi eq, %arg1, %c0_i32_14 : i32
    %35 = arith.extui %34 : i1 to i32
    %c0_i32_15 = arith.constant 0 : i32
    %36 = arith.cmpi ne, %35, %c0_i32_15 : i32
    scf.if %36 {
      %c0_16 = arith.constant 0 : index
      %c0_17 = arith.constant 0 : index
      %37 = vector.load %arg5[%c0_16, %c0_17] : memref<8x128xf32, #tpu.memory_space<vmem>>, vector<8x128xf32>
      %38 = vector.shape_cast %37 : vector<8x128xf32> to vector<1x8x128xf32>
      %cst_18 = arith.constant dense<0.000000e+00> : vector<1xf32>
      %39 = vector.multi_reduction <add>, %38, %cst_18 [1, 2] : vector<1x8x128xf32> to vector<1xf32>
      %40 = vector.shape_cast %39 : vector<1xf32> to vector<1x1x1xf32>
      %41 = vector.extract %40[0, 0, 0] : f32 from vector<1x1x1xf32>
      %c0_19 = arith.constant 0 : index
      %c0_20 = arith.constant 0 : index
      %42 = memref.load %arg4[%c0_19, %c0_20] : memref<1x1xf32, #tpu.memory_space<smem>>
      memref.store %41, %arg4[%c0_19, %c0_20] : memref<1x1xf32, #tpu.memory_space<smem>>
    } else {
    }
    return
  }
  func.func @transform_0(%arg0: i32, %arg1: i32) -> (i32, i32) {
    %c1_i32 = arith.constant 1 : i32
    %0 = arith.muli %arg0, %c1_i32 : i32
    %1 = arith.addi %0, %arg1 : i32
    %c0_i32 = arith.constant 0 : i32
    %2 = arith.minsi %1, %c0_i32 : i32
    %c0_i32_0 = arith.constant 0 : i32
    %c0_i32_1 = arith.constant 0 : i32
    return %2, %c0_i32_0 : i32, i32
  }
  func.func @transform_1(%arg0: i32, %arg1: i32) -> (i32, i32) {
    %c1_i32 = arith.constant 1 : i32
    %0 = arith.muli %arg0, %c1_i32 : i32
    %1 = arith.addi %0, %arg1 : i32
    %c0_i32 = arith.constant 0 : i32
    %2 = arith.minsi %1, %c0_i32 : i32
    %c0_i32_0 = arith.constant 0 : i32
    %c0_i32_1 = arith.constant 0 : i32
    return %2, %c0_i32_0 : i32, i32
  }
  func.func @transform_2(%arg0: i32, %arg1: i32) -> (i32, i32) {
    %c0_i32 = arith.constant 0 : i32
    %c0_i32_0 = arith.constant 0 : i32
    return %arg0, %c0_i32 : i32, i32
  }
}

</mosaic_0001>

<bundles_post_ra>
// kernel: tpu_custom_call.1
= control target key start
LH: loop header
LB: loop body
LE: loop exit
PB: predicated region body
PF: predicated region fallthrough
CT: control target
= control target key end

     0   :  { %7 = vsyncpa [#allocation4], 0  ;;  %s316_s0 = inlined_call_operand.hbm [shape: f32[16,128], index: 0, kind: input, shape index: {}]   ;;  %s317_s1 = inlined_call_operand.hbm [shape: s8[16,128], index: 1, kind: input, shape index: {}]   ;;  %s318_s2 = inlined_call_operand.hbm [shape: f32[1,1], index: 2, kind: output, shape index: {}]  }
   0x1   :  { %8 = vsyncpa [#allocation7], 0 }
   0x2   :  { %9 = vsyncpa [#allocation5], 0  ;;  %s251_s9 = smov [#allocation3]   ;;  %s191_s13 = scalar_lea.hbm %s316_s0, 256 }
   0x3   :  { %s21_s10 = sshll.u32 %s251_s9, 4  ;;  %p192_p0 = scmp.ne.s32.totalorder %s316_s0, %s191_s13  ;;  %s22_s10 = int_to_ptr.vmem [resolvable:$true] %s21_s10 }
   0x4   :  { %p195_p1 = scmp.lt.u32.totalorder %s191_s13, %s316_s0 }
   0x6   :  { %p197_p2 = pnand %p195_p1, %p192_p0 }
   0x8   :  { %200 = shalt.err (!%p197_p2)
}
   0x9   :  { %s201_s18 = scalar_lea.vmem %s22_s10, 256  ;;  %p206_p4 = scmp.lt.s32.totalorder %s22_s10, %s22_s10 }
   0xa   :  { %p202_p3 = scmp.ne.s32.totalorder %s22_s10, %s201_s18  ;;  %p207_p5 = scmp.lt.s32.totalorder %s201_s18, %s201_s18 }
   0xc   :  { %p208_p6 = por %p207_p5, %p206_p4 }
   0xe   :  { %p209_p7 = pnand %p208_p6, %p202_p3 }
  0x10   :  { %212 = shalt.err (!%p209_p7)
}
  0x11   :  { %s252_s19 = smov 128   ;;  %s253_s20 = smov 8  }
  0x12   :  { %27 = dma.hbm_to_vmem [thread:$0]  %s316_s0, 256, %s22_s10, [#allocation4], %s252_s19, %s252_s19, %s253_s20  }
  0x13   :  { %s254_s23 = smov [#allocation6]   ;;  %s213_s27 = scalar_lea.hbm %s317_s1, 64 }
  0x14   :  { %s39_s24 = sshll.u32 %s254_s23, 4  ;;  %p214_p8 = scmp.ne.s32.totalorder %s317_s1, %s213_s27  ;;  %s40_s24 = int_to_ptr.vmem [resolvable:$true] %s39_s24 }
  0x15   :  { %p217_p9 = scmp.lt.u32.totalorder %s213_s27, %s317_s1 }
  0x17   :  { %p219_p10 = pnand %p217_p9, %p214_p8 }
  0x19   :  { %222 = shalt.err (!%p219_p10)
}
  0x1a   :  { %s223_s4 = scalar_lea.vmem %s40_s24, 64  ;;  %p228_p12 = scmp.lt.s32.totalorder %s40_s24, %s40_s24 }
  0x1b   :  { %p224_p11 = scmp.ne.s32.totalorder %s40_s24, %s223_s4  ;;  %p229_p13 = scmp.lt.s32.totalorder %s223_s4, %s223_s4 }
  0x1d   :  { %p230_p0 = por %p229_p13, %p228_p12 }
  0x1f   :  { %p231_p1 = pnand %p230_p0, %p224_p11 }
  0x21   :  { %234 = shalt.err (!%p231_p1)
}
  0x22   :  { %s255_s0 = smov 32   ;;  %s256_s5 = smov 2  }
  0x23   :  { %45 = dma.hbm_to_vmem [thread:$0]  %s317_s1, 64, %s40_s24, [#allocation7], %s255_s0, %s255_s0, %s256_s5  }
  0x24   :  { %245 = dma.done.wait [#allocation4], 256  }
  0x25   :  { %246 = vsyncadd [#allocation4], 4294967040 }
  0x26   :  { %247 = dma.done.wait [#allocation7], 64  }
  0x27   :  { %248 = vsyncadd [#allocation7], 4294967232  ;;  %v65_v0 = vld [vmem:[#allocation3] sm:$0xff]  ;;  %v66_v1 = vld [vmem:[#allocation3 + $0x8] sm:$0xff]  ;;  %vm257_vm8 = vmmov 1   ;;  %s235_s10 = scalar_lea.hbm %s318_s2, 16 }
  0x28   :  { %v73_v2 = vand.u32 2147483647, %v65_v0  ;;  %v74_v3 = vand.u32 2147483647, %v66_v1  ;;  %v166_v8 = vld [vmem:[#allocation6] sm:$0xf]   ;;  %p236_p2 = scmp.ne.s32.totalorder %s318_s2, %s235_s10  ;;  %p239_p3 = scmp.lt.u32.totalorder %s235_s10, %s318_s2 }
  0x29   :  { %v167_v11 = vunpack.c.0.s8 %v166_v8  ;;  %v168_v13 = vunpack.c.1.s8 %v166_v8  ;;  %v81_v19 = vmax.f32 %v65_v0, 0.0  ;;  %v82_v20 = vmax.f32 %v66_v1, 0.0 }
  0x2a   :  { %v75_v4 = vsub.f32 0.0, %v73_v2  ;;  %v76_v5 = vsub.f32 0.0, %v74_v3  ;;  %vm111_vm0 = vcmp.ge.f32.partialorder %v65_v0, 0.0  ;;  %vm112_vm2 = vcmp.ge.f32.partialorder %v66_v1, 0.0  ;;  %p241_p4 = pnand %p239_p3, %p236_p2 }
  0x2b   :  { %v71_v16 = vcvt.s32.f32 %v167_v11  ;;  %v72_v18 = vcvt.s32.f32 %v168_v13 }
  0x2c   :  { %v77_v6 = vmul.f32 1.442695, %v75_v4  ;;  %v79_v7 = vmul.f32 1.442695, %v76_v5 }
  0x2d   :  { %v83_v22 = vmul.f32 %v71_v16, %v65_v0  ;;  %vm113_vm1 = vcmp.eq.f32.partialorder %v71_v16, 1.0  ;;  %v84_v25 = vmul.f32 %v72_v18, %v66_v1  ;;  %vm114_vm3 = vcmp.eq.f32.partialorder %v72_v18, 1.0 }
  0x2e   :  { %179 = vpow2.f32 %v77_v6  ;;  %vm115_vm4 = vmxor %vm111_vm0, %vm113_vm1 }
  0x2f   :  { %181 = vpow2.f32 %v79_v7  ;;  %v85_v29 = vsub.f32 %v81_v19, %v83_v22  ;;  %vm116_vm6 = vmxor %vm112_vm2, %vm114_vm3  ;;  %v86_v33 = vsub.f32 %v82_v20, %v84_v25 }
  0x30   :  { %vm117_vm9 = vmxor %vm115_vm4, %vm257_vm8 }
  0x31   :  { %vm118_vm10 = vmxor %vm116_vm6, %vm257_vm8 }
  0x38   :  { %v180_v9 = vpop.eup %179 }
  0x39   :  { %v182_v10 = vpop.eup %181  ;;  %v87_v12 = vadd.f32 1.0, %v180_v9  ;;  %v90_v15 = vmul.f32 -0.5, %v180_v9  ;;  %v93_v23 = vand.u32 2147483647, %v180_v9 }
  0x3a   :  { %v96_v14 = vadd.f32 1.0, %v182_v10  ;;  %v99_v17 = vmul.f32 -0.5, %v182_v10  ;;  %v102_v26 = vand.u32 2147483647, %v182_v10 }
  0x3b   :  { %183 = vlog2.f32 %v87_v12  ;;  %v91_v21 = vadd.f32 1.0, %v90_v15  ;;  %vm298_vm5 = vcmp.lt.f32.partialorder %v93_v23, 0.0004427343 }
  0x3c   :  { %185 = vlog2.f32 %v96_v14  ;;  %v100_v24 = vadd.f32 1.0, %v99_v17  ;;  %vm103_vm7 = vcmp.lt.f32.partialorder %v102_v26, 0.0004427343 }
  0x3d   :  { %187 = vrcp.f32 %v87_v12  ;;  %v92_v27 = vmul.f32 %v180_v9, %v91_v21 }
  0x3e   :  { %189 = vrcp.f32 %v96_v14  ;;  %v101_v31 = vmul.f32 %v182_v10, %v100_v24 }
  0x45   :  { %v184_v28 = vpop.eup %183 }
  0x46   :  { %v186_v32 = vpop.eup %185  ;;  %v89_v34 = vmul.f32 0.6931472, %v184_v28 }
  0x47   :  { %v188_v35 = vpop.eup %187  ;;  %v98_v36 = vmul.f32 0.6931472, %v186_v32 }
  0x48   :  { %v190_v37 = vpop.eup %189  ;;  %v95_v38 = vsel %vm298_vm5, %v92_v27, %v89_v34  ;;  %v119_v39 = vmul.f32 %v188_v35, %v180_v9 }
  0x49   :  { %v104_v40 = vsel %vm103_vm7, %v101_v31, %v98_v36  ;;  %v105_v41 = vadd.f32 %v95_v38, %v85_v29  ;;  %v120_v42 = vmul.f32 %v190_v37, %v182_v10 }
  0x4a   :  { %v106_v43 = vadd.f32 %v104_v40, %v86_v33  ;;  %v121_v44 = vsel %vm117_vm9, %v119_v39, %v188_v35 }
  0x4b   :  { %v122_v45 = vsel %vm118_vm10, %v120_v42, %v190_v37  ;;  %v123_v46 = vmul.f32 %v121_v44, %v121_v44 }
  0x4c   :  { %v124_v47 = vmul.f32 %v122_v45, %v122_v45 }
  0x4d   :  { %v125_v48 = vmul.f32 %v123_v46, %v105_v41 }
  0x4e   :  { %v126_v49 = vmul.f32 %v124_v47, %v106_v43 }
  0x50   :  { %v128_v50 = vadd.f32 %v126_v49, %v125_v48 }
  0x52   :  { %135 = vadd.xlane.f32.xlu0 %v128_v50 }
  0xdf   :  { %v136_v51 = vpop.xlane.xlu0 %135 }
  0xe0   :  { %v137_v52 = vrot.slane %v136_v51, 4 }
  0xe2   :  { %v138_v53 = vadd.f32 %v137_v52, %v136_v51 }
  0xe4   :  { %v139_v54 = vrot.slane %v138_v53, 2 }
  0xe6   :  { %v140_v55 = vadd.f32 %v139_v54, %v138_v53 }
  0xe8   :  { %v141_v56 = vrot.slane %v140_v55, 1 }
  0xea   :  { %v142_v57 = vadd.f32 %v141_v56, %v140_v55 }
  0xec   :  { %169 = vpush %v142_v57 }
 0x11d   :  { %s170_s1 = spop %169 }
 0x11e   :  { %145 = sst [smem:[#allocation8]] %s170_s1 }
 0x11f   :  { %244 = shalt.err (!%p241_p4)
}
 0x120   :  { %s258_s15 = smov [#allocation8]  }
 0x121   :  { %153 = dma.smem_to_hbm %s258_s15, 16, %s318_s2, [#allocation5]  }
 0x122   :  { %249 = dma.done.wait [#allocation5], 16  }
 0x123   :  { %250 = vsyncadd [#allocation5], 4294967280 }
 0x124   :  { %157 = sfence }
 0x125   :  { %158 = vsyncpa [#allocation4], 1 }
 0x126   :  { %159 = vsyncpa [#allocation7], 1 }
 0x127   :  { %160 = vsyncpa [#allocation5], 1 }

</bundles_post_ra>
